<compile_context>
chip_gen: v6e
topology: v6e:2x2x1
jax: 0.10.0
libtpu: 0.0.40
codegen_flags: <defaults>
</compile_context>

<pallas_src>
import jax
import jax.numpy as jnp
from jax.experimental import pallas as pl
from jax.experimental.pallas import tpu as pltpu

LN_EPS = 1e-5  # nn.LayerNorm default


def _round_up(a, b):
    return (a + b - 1) // b * b


def _vmem_capacity_bytes():
    try:
        return int(pltpu.get_tpu_info().vmem_capacity_bytes)
    except Exception:
        return 64 << 20  # conservative per-core default (v7x)


def _layernorm(h, gamma, beta):
    # Fused statistics: one elementwise pass, biased var = E[x^2] - E[x]^2
    # (matches PyTorch LayerNorm).
    mu = jnp.mean(h, axis=-1, keepdims=True)
    ex2 = jnp.mean(h * h, axis=-1, keepdims=True)
    var = jnp.maximum(ex2 - mu * mu, 0.0)
    return (h - mu) * jax.lax.rsqrt(var + LN_EPS) * gamma + beta


def decoder_kernel(x_ref, w1_ref, w2_ref, vec_ref, w3_ref, b3_ref, o_ref, h_ref):
    """Grid = (row tiles, vocab tiles); vocab is the inner ('arbitrary') axis."""
    j = pl.program_id(1)

    # Layers 1-2 depend only on the row tile -> compute them once per row tile
    # (at the first vocab step) and persist the result in VMEM scratch.
    @pl.when(j == 0)
    def _():
        x = x_ref[...]                               # (tm, H) bf16
        vecs = vec_ref[...].astype(jnp.float32)      # (6, H) f32
        b1, g1, be1 = vecs[0:1], vecs[1:2], vecs[2:3]
        b2, g2, be2 = vecs[3:4], vecs[4:5], vecs[5:6]

        # Linear 1 + ReLU + LayerNorm (f32 accumulation / elementwise math).
        h = jnp.dot(x, w1_ref[...], preferred_element_type=jnp.float32) + b1
        h = jnp.maximum(h, 0.0)
        h = _layernorm(h, g1, be1)

        # Dropout(0.1): identity in eval mode (deterministic inference).
        # TODO(synk): training-mode dropout would need pltpu.prng_seed/prng_random_bits.

        # Linear 2 + ReLU + LayerNorm.
        h = jnp.dot(h.astype(w2_ref.dtype), w2_ref[...],
                    preferred_element_type=jnp.float32) + b2
        h = jnp.maximum(h, 0.0)
        h = _layernorm(h, g2, be2)

        h_ref[...] = h.astype(h_ref.dtype)

    # Final projection: one vocab tile per grid step, lane-dense output store.
    out = jnp.dot(h_ref[...], w3_ref[...], preferred_element_type=jnp.float32)
    out = out + b3_ref[...].astype(jnp.float32)
    o_ref[...] = out.astype(o_ref.dtype)


def _pick_row_tile(n_rows, tile_rows):
    """Pick the row tile: largest of {512,256,128} (capped at tile_rows) whose
    last-tile padding waste is <= 25%; otherwise the one minimizing padding.
    Tiny problems get a single tile covering everything."""
    if n_rows <= 128 or tile_rows <= 128:
        return min(_round_up(tile_rows, 16), _round_up(n_rows, 16))
    cands = [t for t in (512, 256, 128) if t <= tile_rows]
    for t in cands:  # largest first -> highest FLOPs/byte vs the streamed w3 tile
        n_pad = _round_up(n_rows, t)
        if (n_pad - n_rows) * 4 <= n_pad:
            return t
    return min(cands, key=lambda t: (_round_up(n_rows, t), -t))


def quantization_decoder(hidden_states, params, *, tile_rows=512, tile_vocab=512,
                         compute_dtype=jnp.bfloat16, out_dtype=None):
    """hidden_states: (B, S, H) float32.  params: dict of f32 weights (see init_params).

    out_dtype: pass jnp.bfloat16 to halve the logits writeback if the
    downstream consumer (softmax / argmax / loss) accepts bf16.
    """
    B, S, H = hidden_states.shape
    V = params["w3"].shape[1]
    N = B * S
    out_dtype = hidden_states.dtype if out_dtype is None else out_dtype

    # --- tile sizes: shrink gracefully for small problems, pad to multiples.
    tm = _pick_row_tile(N, tile_rows)                       # rows (sublane axis)
    tv = min(_round_up(tile_vocab, 128), _round_up(V, 128))  # vocab lanes
    n_pad = _round_up(N, tm)
    v_pad = _round_up(V, tv)

    cbytes = jnp.dtype(compute_dtype).itemsize
    obytes = jnp.dtype(out_dtype).itemsize

    x2d = hidden_states.reshape(N, H).astype(compute_dtype)
    if n_pad != N:
        x2d = jnp.pad(x2d, ((0, n_pad - N), (0, 0)))

    w1 = params["w1"].astype(compute_dtype)
    w2 = params["w2"].astype(compute_dtype)
    w3 = params["w3"].astype(compute_dtype)
    b3 = params["b3"].astype(jnp.float32)
    if v_pad != V:
        w3 = jnp.pad(w3, ((0, 0), (0, v_pad - V)))
        b3 = jnp.pad(b3, ((0, 0), (0, v_pad - V)))

    # Stack the six small per-layer vectors into a single operand.
    vecs = jnp.concatenate(
        [params["b1"], params["g1"], params["be1"],
         params["b2"], params["g2"], params["be2"]], axis=0).astype(jnp.float32)

    grid = (n_pad // tm, v_pad // tv)

    def build(use_pipeline_modes):
        w3_bufs = 3 if use_pipeline_modes else 2
        const_bufs = 1 if use_pipeline_modes else 2

        # Honest VMEM footprint: per-buffer accounting + f32 LN temporaries.
        est = (2 * tm * H * cbytes                  # x row tile (double-buffered)
               + const_bufs * 2 * H * H * cbytes    # w1, w2 (grid-invariant)
               + const_bufs * 8 * H * 4             # stacked vectors (sublane-padded)
               + w3_bufs * H * tv * cbytes          # streamed w3 vocab tiles
               + 2 * 8 * tv * 4                     # b3 tile (sublane-padded)
               + 2 * tm * tv * obytes               # output tile
               + tm * H * cbytes                    # hidden-state scratch
               + 4 * tm * H * 4)                    # f32 LayerNorm temps at j == 0
        vmem_cap = _vmem_capacity_bytes()
        vmem_limit = int(max(16 << 20, min(int(vmem_cap * 0.8), est + (8 << 20))))

        def spec(shape, index_map, buffers=None):
            if use_pipeline_modes and buffers is not None:
                return pl.BlockSpec(shape, index_map,
                                    pipeline_mode=pl.Buffered(buffers))
            return pl.BlockSpec(shape, index_map)

        return pl.pallas_call(
            decoder_kernel,
            out_shape=jax.ShapeDtypeStruct((n_pad, v_pad), out_dtype),
            grid_spec=pltpu.PrefetchScalarGridSpec(
                num_scalar_prefetch=0,
                grid=grid,
                in_specs=[
                    spec((tm, H), lambda i, j: (i, 0)),            # x rows
                    spec((H, H), lambda i, j: (0, 0), buffers=1),  # w1 (resident)
                    spec((H, H), lambda i, j: (0, 0), buffers=1),  # w2 (resident)
                    spec((6, H), lambda i, j: (0, 0), buffers=1),  # b1,g1,be1,b2,g2,be2
                    spec((H, tv), lambda i, j: (0, j), buffers=3),  # w3 vocab tile
                    spec((1, tv), lambda i, j: (0, j)),             # b3 vocab tile
                ],
                out_specs=pl.BlockSpec((tm, tv), lambda i, j: (i, j)),
                scratch_shapes=[pltpu.VMEM((tm, H), compute_dtype)],
            ),
            compiler_params=pltpu.CompilerParams(
                dimension_semantics=("parallel", "arbitrary"),
                vmem_limit_bytes=vmem_limit),
        )

    try:
        out2d = jax.block_until_ready(build(True)(x2d, w1, w2, vecs, w3, b3))
    except Exception:
        # Fallback for jax versions without BlockSpec(pipeline_mode=...) /
        # Buffered(1): identical math, default double-buffering everywhere.
        out2d = jax.block_until_ready(build(False)(x2d, w1, w2, vecs, w3, b3))

    return out2d[:N, :V].reshape(B, S, V)


def init_params(key, hidden_size, vocab_size):
    ks = jax.random.split(key, 6)
    scale = 1.0 / jnp.sqrt(hidden_size)
    # Weights stored as (in, out) so the kernel does x @ W  (== x @ W_pt.T in torch).
    return {
        "w1": jax.random.normal(ks[0], (hidden_size, hidden_size), jnp.float32) * scale,
        "b1": jax.random.normal(ks[1], (1, hidden_size), jnp.float32) * 0.01,
        "g1": jnp.ones((1, hidden_size), jnp.float32),
        "be1": jnp.zeros((1, hidden_size), jnp.float32),
        "w2": jax.random.normal(ks[2], (hidden_size, hidden_size), jnp.float32) * scale,
        "b2": jax.random.normal(ks[3], (1, hidden_size), jnp.float32) * 0.01,
        "g2": jnp.ones((1, hidden_size), jnp.float32),
        "be2": jnp.zeros((1, hidden_size), jnp.float32),
        "w3": jax.random.normal(ks[4], (hidden_size, vocab_size), jnp.float32) * scale,
        "b3": jax.random.normal(ks[5], (1, vocab_size), jnp.float32) * 0.01,
    }


def reference(hidden_states, p, compute_dtype=jnp.bfloat16):
    """Pure-JAX reference (eval-mode Dropout, same bf16-matmul / f32-LN recipe)."""
    def mm(a, w):
        return jnp.dot(a.astype(compute_dtype), w.astype(compute_dtype),
                       preferred_element_type=jnp.float32)
    x = hidden_states.astype(jnp.float32)
    h = jnp.maximum(mm(x, p["w1"]) + p["b1"], 0.0)
    h = _layernorm(h, p["g1"], p["be1"])
    h = jnp.maximum(mm(h, p["w2"]) + p["b2"], 0.0)
    h = _layernorm(h, p["g2"], p["be2"])
    return mm(h, p["w3"]) + p["b3"]


if __name__ == "__main__":
    key = jax.random.PRNGKey(0)
    k_x, k_p = jax.random.split(key)

    batch, seq, hidden, vocab = 2, 8, 32, 64
    hidden_states = jax.random.normal(k_x, (batch, seq, hidden), jnp.float32)
    params = init_params(k_p, hidden, vocab)

    out = quantization_decoder(hidden_states, params)
    out = jax.block_until_ready(out)

    ref = reference(hidden_states, params)
    assert out.shape == (batch, seq, vocab)
    # bf16 matmul inputs -> loosened tolerance vs the f32-weight PyTorch module.
    assert jnp.allclose(out, ref.reshape(batch, seq, vocab), atol=2e-2, rtol=2e-2), \
        "mismatch vs JAX reference"

    print("KERNEL_OK")
</pallas_src>

<mosaic_0001>
module attributes {stable_mosaic.version = 11 : i64} {
  func.func @decoder_kernel(%arg0: i32, %arg1: i32, %arg2: memref<16x32xbf16, #tpu.memory_space<vmem>>, %arg3: memref<32x32xbf16, #tpu.memory_space<vmem>>, %arg4: memref<32x32xbf16, #tpu.memory_space<vmem>>, %arg5: memref<6x32xf32, #tpu.memory_space<vmem>>, %arg6: memref<32x128xbf16, #tpu.memory_space<vmem>>, %arg7: memref<1x128xf32, #tpu.memory_space<vmem>>, %arg8: memref<16x128xf32, #tpu.memory_space<vmem>>, %arg9: memref<16x32xbf16, #tpu.memory_space<vmem>>) attributes {dimension_semantics = [#tpu.dimension_semantics<parallel>, #tpu.dimension_semantics<arbitrary>], iteration_bounds = array<i64: 1, 1>, scalar_prefetch = 0 : i64, scratch_operands = 1 : i64, tpu.core_type = #tpu.core_type<tc>, window_params = [{transform_indices = @transform_0, window_bounds = array<i64: 16, 32>}, {pipeline_mode = #tpu.pipeline_mode<synchronous>, transform_indices = @transform_1, window_bounds = array<i64: 32, 32>}, {pipeline_mode = #tpu.pipeline_mode<synchronous>, transform_indices = @transform_2, window_bounds = array<i64: 32, 32>}, {pipeline_mode = #tpu.pipeline_mode<synchronous>, transform_indices = @transform_3, window_bounds = array<i64: 6, 32>}, {transform_indices = @transform_4, window_bounds = array<i64: 32, 128>}, {transform_indices = @transform_5, window_bounds = array<i64: 1, 128>}, {transform_indices = @transform_6, window_bounds = array<i64: 16, 128>}]} {
    %c0_i32 = arith.constant 0 : i32
    %0 = arith.cmpi eq, %arg1, %c0_i32 : i32
    %1 = arith.extui %0 : i1 to i32
    %c0_i32_0 = arith.constant 0 : i32
    %2 = arith.cmpi ne, %1, %c0_i32_0 : i32
    scf.if %2 {
      %c0_8 = arith.constant 0 : index
      %c0_9 = arith.constant 0 : index
      %10 = vector.load %arg2[%c0_8, %c0_9] : memref<16x32xbf16, #tpu.memory_space<vmem>>, vector<16x32xbf16>
      %c0_10 = arith.constant 0 : index
      %c0_11 = arith.constant 0 : index
      %11 = vector.load %arg5[%c0_10, %c0_11] : memref<6x32xf32, #tpu.memory_space<vmem>>, vector<6x32xf32>
      %12 = vector.extract_strided_slice %11 {offsets = [0, 0], sizes = [1, 32], strides = [1, 1]} : vector<6x32xf32> to vector<1x32xf32>
      %13 = vector.extract_strided_slice %11 {offsets = [1, 0], sizes = [1, 32], strides = [1, 1]} : vector<6x32xf32> to vector<1x32xf32>
      %14 = vector.extract_strided_slice %11 {offsets = [2, 0], sizes = [1, 32], strides = [1, 1]} : vector<6x32xf32> to vector<1x32xf32>
      %15 = vector.extract_strided_slice %11 {offsets = [3, 0], sizes = [1, 32], strides = [1, 1]} : vector<6x32xf32> to vector<1x32xf32>
      %16 = vector.extract_strided_slice %11 {offsets = [4, 0], sizes = [1, 32], strides = [1, 1]} : vector<6x32xf32> to vector<1x32xf32>
      %17 = vector.extract_strided_slice %11 {offsets = [5, 0], sizes = [1, 32], strides = [1, 1]} : vector<6x32xf32> to vector<1x32xf32>
      %c0_12 = arith.constant 0 : index
      %c0_13 = arith.constant 0 : index
      %18 = vector.load %arg3[%c0_12, %c0_13] : memref<32x32xbf16, #tpu.memory_space<vmem>>, vector<32x32xbf16>
      %cst_14 = arith.constant dense<0.000000e+00> : vector<16x32xf32>
      %19 = tpu.matmul %10, %18, %cst_14 {dimension_numbers = #tpu.dot_dimension_numbers<[1], [0], [0], [1], [0, 0, 1, 1], [], []>} : vector<16x32xbf16>, vector<32x32xbf16>, vector<16x32xf32> -> vector<16x32xf32>
      %20 = vector.broadcast %12 : vector<1x32xf32> to vector<16x32xf32>
      %21 = arith.addf %19, %20 : vector<16x32xf32>
      %cst_15 = arith.constant 0.000000e+00 : f32
      %22 = vector.broadcast %cst_15 : f32 to vector<16x32xf32>
      %23 = arith.maximumf %21, %22 : vector<16x32xf32>
      %cst_16 = arith.constant dense<0.000000e+00> : vector<16xf32>
      %24 = vector.multi_reduction <add>, %23, %cst_16 [1] : vector<16x32xf32> to vector<16xf32>
      %25 = vector.shape_cast %24 : vector<16xf32> to vector<16x1xf32>
      %cst_17 = arith.constant 3.200000e+01 : f32
      %26 = vector.broadcast %cst_17 : f32 to vector<16x1xf32>
      %27 = arith.divf %25, %26 : vector<16x1xf32>
      %28 = arith.mulf %23, %23 : vector<16x32xf32>
      %cst_18 = arith.constant dense<0.000000e+00> : vector<16xf32>
      %29 = vector.multi_reduction <add>, %28, %cst_18 [1] : vector<16x32xf32> to vector<16xf32>
      %30 = vector.shape_cast %29 : vector<16xf32> to vector<16x1xf32>
      %cst_19 = arith.constant 3.200000e+01 : f32
      %31 = vector.broadcast %cst_19 : f32 to vector<16x1xf32>
      %32 = arith.divf %30, %31 : vector<16x1xf32>
      %33 = arith.mulf %27, %27 : vector<16x1xf32>
      %34 = arith.subf %32, %33 : vector<16x1xf32>
      %cst_20 = arith.constant 0.000000e+00 : f32
      %35 = vector.broadcast %cst_20 : f32 to vector<16x1xf32>
      %36 = arith.maximumf %34, %35 : vector<16x1xf32>
      %37 = vector.broadcast %27 : vector<16x1xf32> to vector<16x32xf32>
      %38 = arith.subf %23, %37 : vector<16x32xf32>
      %cst_21 = arith.constant 9.99999974E-6 : f32
      %39 = vector.broadcast %cst_21 : f32 to vector<16x1xf32>
      %40 = arith.addf %36, %39 : vector<16x1xf32>
      %41 = math.rsqrt %40 : vector<16x1xf32>
      %42 = vector.broadcast %41 : vector<16x1xf32> to vector<16x32xf32>
      %43 = arith.mulf %38, %42 : vector<16x32xf32>
      %44 = vector.broadcast %13 : vector<1x32xf32> to vector<16x32xf32>
      %45 = arith.mulf %43, %44 : vector<16x32xf32>
      %46 = vector.broadcast %14 : vector<1x32xf32> to vector<16x32xf32>
      %47 = arith.addf %45, %46 : vector<16x32xf32>
      %48 = arith.truncf %47 : vector<16x32xf32> to vector<16x32xbf16>
      %c0_22 = arith.constant 0 : index
      %c0_23 = arith.constant 0 : index
      %49 = vector.load %arg4[%c0_22, %c0_23] : memref<32x32xbf16, #tpu.memory_space<vmem>>, vector<32x32xbf16>
      %cst_24 = arith.constant dense<0.000000e+00> : vector<16x32xf32>
      %50 = tpu.matmul %48, %49, %cst_24 {dimension_numbers = #tpu.dot_dimension_numbers<[1], [0], [0], [1], [0, 0, 1, 1], [], []>} : vector<16x32xbf16>, vector<32x32xbf16>, vector<16x32xf32> -> vector<16x32xf32>
      %51 = vector.broadcast %15 : vector<1x32xf32> to vector<16x32xf32>
      %52 = arith.addf %50, %51 : vector<16x32xf32>
      %cst_25 = arith.constant 0.000000e+00 : f32
      %53 = vector.broadcast %cst_25 : f32 to vector<16x32xf32>
      %54 = arith.maximumf %52, %53 : vector<16x32xf32>
      %cst_26 = arith.constant dense<0.000000e+00> : vector<16xf32>
      %55 = vector.multi_reduction <add>, %54, %cst_26 [1] : vector<16x32xf32> to vector<16xf32>
      %56 = vector.shape_cast %55 : vector<16xf32> to vector<16x1xf32>
      %cst_27 = arith.constant 3.200000e+01 : f32
      %57 = vector.broadcast %cst_27 : f32 to vector<16x1xf32>
      %58 = arith.divf %56, %57 : vector<16x1xf32>
      %59 = arith.mulf %54, %54 : vector<16x32xf32>
      %cst_28 = arith.constant dense<0.000000e+00> : vector<16xf32>
      %60 = vector.multi_reduction <add>, %59, %cst_28 [1] : vector<16x32xf32> to vector<16xf32>
      %61 = vector.shape_cast %60 : vector<16xf32> to vector<16x1xf32>
      %cst_29 = arith.constant 3.200000e+01 : f32
      %62 = vector.broadcast %cst_29 : f32 to vector<16x1xf32>
      %63 = arith.divf %61, %62 : vector<16x1xf32>
      %64 = arith.mulf %58, %58 : vector<16x1xf32>
      %65 = arith.subf %63, %64 : vector<16x1xf32>
      %cst_30 = arith.constant 0.000000e+00 : f32
      %66 = vector.broadcast %cst_30 : f32 to vector<16x1xf32>
      %67 = arith.maximumf %65, %66 : vector<16x1xf32>
      %68 = vector.broadcast %58 : vector<16x1xf32> to vector<16x32xf32>
      %69 = arith.subf %54, %68 : vector<16x32xf32>
      %cst_31 = arith.constant 9.99999974E-6 : f32
      %70 = vector.broadcast %cst_31 : f32 to vector<16x1xf32>
      %71 = arith.addf %67, %70 : vector<16x1xf32>
      %72 = math.rsqrt %71 : vector<16x1xf32>
      %73 = vector.broadcast %72 : vector<16x1xf32> to vector<16x32xf32>
      %74 = arith.mulf %69, %73 : vector<16x32xf32>
      %75 = vector.broadcast %16 : vector<1x32xf32> to vector<16x32xf32>
      %76 = arith.mulf %74, %75 : vector<16x32xf32>
      %77 = vector.broadcast %17 : vector<1x32xf32> to vector<16x32xf32>
      %78 = arith.addf %76, %77 : vector<16x32xf32>
      %79 = arith.truncf %78 : vector<16x32xf32> to vector<16x32xbf16>
      %c0_32 = arith.constant 0 : index
      %c0_33 = arith.constant 0 : index
      %80 = vector.load %arg9[%c0_32, %c0_33] : memref<16x32xbf16, #tpu.memory_space<vmem>>, vector<16x32xbf16>
      tpu.vector_store %arg9[%c0_32, %c0_33], %79 {strides = array<i32>} : memref<16x32xbf16, #tpu.memory_space<vmem>>, vector<16x32xbf16>,
    } else {
    }
    %c0 = arith.constant 0 : index
    %c0_1 = arith.constant 0 : index
    %3 = vector.load %arg9[%c0, %c0_1] : memref<16x32xbf16, #tpu.memory_space<vmem>>, vector<16x32xbf16>
    %c0_2 = arith.constant 0 : index
    %c0_3 = arith.constant 0 : index
    %4 = vector.load %arg6[%c0_2, %c0_3] : memref<32x128xbf16, #tpu.memory_space<vmem>>, vector<32x128xbf16>
    %cst = arith.constant dense<0.000000e+00> : vector<16x128xf32>
    %5 = tpu.matmul %3, %4, %cst {dimension_numbers = #tpu.dot_dimension_numbers<[1], [0], [0], [1], [0, 0, 1, 1], [], []>} : vector<16x32xbf16>, vector<32x128xbf16>, vector<16x128xf32> -> vector<16x128xf32>
    %c0_4 = arith.constant 0 : index
    %c0_5 = arith.constant 0 : index
    %6 = vector.load %arg7[%c0_4, %c0_5] : memref<1x128xf32, #tpu.memory_space<vmem>>, vector<1x128xf32>
    %7 = vector.broadcast %6 : vector<1x128xf32> to vector<16x128xf32>
    %8 = arith.addf %5, %7 : vector<16x128xf32>
    %c0_6 = arith.constant 0 : index
    %c0_7 = arith.constant 0 : index
    %9 = vector.load %arg8[%c0_6, %c0_7] : memref<16x128xf32, #tpu.memory_space<vmem>>, vector<16x128xf32>
    tpu.vector_store %arg8[%c0_6, %c0_7], %8 {strides = array<i32>} : memref<16x128xf32, #tpu.memory_space<vmem>>, vector<16x128xf32>,
    return
  }
  func.func @transform_0(%arg0: i32, %arg1: i32) -> (i32, i32) {
    %c0_i32 = arith.constant 0 : i32
    %c0_i32_0 = arith.constant 0 : i32
    return %arg0, %c0_i32 : i32, i32
  }
  func.func @transform_1(%arg0: i32, %arg1: i32) -> (i32, i32) {
    %c0_i32 = arith.constant 0 : i32
    %c0_i32_0 = arith.constant 0 : i32
    %c0_i32_1 = arith.constant 0 : i32
    return %c0_i32, %c0_i32_0 : i32, i32
  }
  func.func @transform_2(%arg0: i32, %arg1: i32) -> (i32, i32) {
    %c0_i32 = arith.constant 0 : i32
    %c0_i32_0 = arith.constant 0 : i32
    %c0_i32_1 = arith.constant 0 : i32
    return %c0_i32, %c0_i32_0 : i32, i32
  }
  func.func @transform_3(%arg0: i32, %arg1: i32) -> (i32, i32) {
    %c0_i32 = arith.constant 0 : i32
    %c0_i32_0 = arith.constant 0 : i32
    %c0_i32_1 = arith.constant 0 : i32
    return %c0_i32, %c0_i32_0 : i32, i32
  }
  func.func @transform_4(%arg0: i32, %arg1: i32) -> (i32, i32) {
    %c0_i32 = arith.constant 0 : i32
    %c0_i32_0 = arith.constant 0 : i32
    return %c0_i32, %arg1 : i32, i32
  }
  func.func @transform_5(%arg0: i32, %arg1: i32) -> (i32, i32) {
    %c0_i32 = arith.constant 0 : i32
    %c0_i32_0 = arith.constant 0 : i32
    return %c0_i32, %arg1 : i32, i32
  }
  func.func @transform_6(%arg0: i32, %arg1: i32) -> (i32, i32) {
    %c0_i32 = arith.constant 0 : i32
    return %arg0, %arg1 : i32, i32
  }
}

</mosaic_0001>

<bundles_post_ra>
// kernel: tpu_custom_call.1
= control target key start
LH: loop header
LB: loop body
LE: loop exit
PB: predicated region body
PF: predicated region fallthrough
CT: control target
= control target key end

     0   :  { %11 = vsyncpa [#allocation4], 0  ;;  %s754_s0 = inlined_call_operand.hbm [shape: bf16[16,32], index: 0, kind: input, shape index: {}]   ;;  %s755_s1 = inlined_call_operand.hbm [shape: bf16[32,32], index: 1, kind: input, shape index: {}]   ;;  %s756_s2 = inlined_call_operand.hbm [shape: bf16[32,32], index: 2, kind: input, shape index: {}]   ;;  %s757_s3 = inlined_call_operand.hbm [shape: f32[6,32], index: 3, kind: input, shape index: {}]   ;;  %s758_s4 = inlined_call_operand.hbm [shape: bf16[32,128], index: 4, kind: input, shape index: {}]   ;;  %s759_s5 = inlined_call_operand.vmem [shape: f32[1,128], index: 5, kind: input, shape index: {}]   ;;  %s760_s6 = inlined_call_operand.hbm [shape: f32[16,128], index: 6, kind: output, shape index: {}]  }
   0x1   :  { %12 = vsyncpa [#allocation7], 0 }
   0x2   :  { %13 = vsyncpa [#allocation10], 0 }
   0x3   :  { %14 = vsyncpa [#allocation5], 0  ;;  %s638_s21 = smov [#allocation6]   ;;  %s639_s23 = smov [#allocation9]  }
   0x4   :  { %s32_s22 = sshll.u32 %s638_s21, 4  ;;  %s57_s24 = sshll.u32 %s639_s23, 4  ;;  %s33_s22 = int_to_ptr.vmem [resolvable:$true] %s32_s22  ;;  %s58_s24 = int_to_ptr.vmem [resolvable:$true] %s57_s24 }
   0x5   :  { %s518_s25 = scalar_lea.vmem %s33_s22, 256  ;;  %p523_p1 = scmp.lt.s32.totalorder %s33_s22, %s33_s22 }
   0x6   :  { %p519_p0 = scmp.ne.s32.totalorder %s33_s22, %s518_s25  ;;  %p524_p2 = scmp.lt.s32.totalorder %s518_s25, %s518_s25 }
   0x8   :  { %p525_p3 = por %p524_p2, %p523_p1 }
   0xa   :  { %p526_p4 = pnand %p525_p3, %p519_p0 }
   0xc   :  { %529 = shalt.err (!%p526_p4)
}
   0xd   :  { %s640_s26 = smov 64   ;;  %s641_s27 = smov 4  }
   0xe   :  { %38 = dma.hbm_to_vmem [thread:$0]  %s755_s1, 256, %s33_s22, [#allocation7], %s640_s26, %s640_s26, %s641_s27  }
   0xf   :  { %s538_s30 = scalar_lea.vmem %s58_s24, 128  ;;  %p543_p6 = scmp.lt.s32.totalorder %s58_s24, %s58_s24 }
  0x10   :  { %p539_p5 = scmp.ne.s32.totalorder %s58_s24, %s538_s30  ;;  %p544_p7 = scmp.lt.s32.totalorder %s538_s30, %s538_s30 }
  0x12   :  { %p545_p8 = por %p544_p7, %p543_p6 }
  0x14   :  { %p546_p9 = pnand %p545_p8, %p539_p5 }
  0x16   :  { %549 = shalt.err (!%p546_p9)
}
  0x17   :  { %60 = dma.hbm_to_vmem [thread:$0]  %s757_s3, 128, %s58_s24, [#allocation10]  }
  0x18   :  { %s642_s9 = smov [#allocation3]   ;;  %s643_s11 = smov [#allocation8]  }
  0x19   :  { %s20_s10 = sshll.u32 %s642_s9, 4  ;;  %s44_s12 = sshll.u32 %s643_s11, 4  ;;  %s21_s10 = int_to_ptr.vmem [resolvable:$true] %s20_s10  ;;  %s45_s12 = int_to_ptr.vmem [resolvable:$true] %s44_s12 }
  0x1a   :  { %s558_s13 = scalar_lea.vmem %s21_s10, 128  ;;  %p563_p11 = scmp.lt.s32.totalorder %s21_s10, %s21_s10 }
  0x1b   :  { %p559_p10 = scmp.ne.s32.totalorder %s21_s10, %s558_s13  ;;  %p564_p12 = scmp.lt.s32.totalorder %s558_s13, %s558_s13 }
  0x1d   :  { %p565_p13 = por %p564_p12, %p563_p11 }
  0x1f   :  { %p566_p0 = pnand %p565_p13, %p559_p10 }
  0x21   :  { %569 = shalt.err (!%p566_p0)
}
  0x22   :  { %26 = dma.hbm_to_vmem [thread:$0]  %s754_s0, 128, %s21_s10, [#allocation4], %s640_s26, %s640_s26, %s641_s27  }
  0x23   :  { %s578_s3 = scalar_lea.vmem %s45_s12, 256  ;;  %p583_p2 = scmp.lt.s32.totalorder %s45_s12, %s45_s12 }
  0x24   :  { %p579_p1 = scmp.ne.s32.totalorder %s45_s12, %s578_s3  ;;  %p584_p3 = scmp.lt.s32.totalorder %s578_s3, %s578_s3 }
  0x26   :  { %p585_p4 = por %p584_p3, %p583_p2 }
  0x28   :  { %p586_p5 = pnand %p585_p4, %p579_p1 }
  0x2a   :  { %589 = shalt.err (!%p586_p5)
}
  0x2b   :  { %50 = dma.hbm_to_vmem [thread:$0]  %s756_s2, 256, %s45_s12, [#allocation7], %s640_s26, %s640_s26, %s641_s27  }
  0x2c   :  { %s644_s17 = smov [#allocation11]  }
  0x2d   :  { %s66_s18 = sshll.u32 %s644_s17, 4  ;;  %s67_s18 = int_to_ptr.vmem [resolvable:$true] %s66_s18 }
  0x2e   :  { %s598_s19 = scalar_lea.vmem %s67_s18, 256  ;;  %p603_p7 = scmp.lt.s32.totalorder %s67_s18, %s67_s18 }
  0x2f   :  { %p599_p6 = scmp.ne.s32.totalorder %s67_s18, %s598_s19  ;;  %p604_p8 = scmp.lt.s32.totalorder %s598_s19, %s598_s19 }
  0x31   :  { %p605_p9 = por %p604_p8, %p603_p7 }
  0x33   :  { %p606_p10 = pnand %p605_p9, %p599_p6 }
  0x35   :  { %609 = shalt.err (!%p606_p10)
}
  0x36   :  { %72 = dma.hbm_to_vmem [thread:$0]  %s758_s4, 256, %s67_s18, [#allocation10], %s640_s26, %s640_s26, %s641_s27  }
  0x37   :  { %630 = dma.done.wait [#allocation4], 128  }
  0x38   :  { %631 = vsyncadd [#allocation4], 4294967168 }
  0x39   :  { %632 = dma.done.wait [#allocation7], 512  }
  0x3a   :  { %633 = vsyncadd [#allocation7], 4294966784 }
  0x3b   :  { %634 = dma.done.wait [#allocation10], 384  }
  0x3c   :  { %635 = vsyncadd [#allocation10], 4294966912  ;;  %v645_v0 = vmov 0.0   ;;  %vm646_vm0 = vmmov 0   ;;  %v494_v1 = vld [vmem:[#allocation6 + $0x8] sm:$0xff]   ;;  %v495_v2 = vld [vmem:[#allocation6] sm:$0xff]   ;;  %v102_v4 = vlaneseq }
  0x3d   :  { %458 = vmatprep.subr.bf16.mxu0 %v645_v0  ;;  %462 = vmatprep.mubr.msk.bf16.mxu0 %vm646_vm0, %v645_v0  ;;  %v496_v3 = vld [vmem:[#allocation3] sm:$0xff]   ;;  %vm123_vm1 = vcmask 261120   ;;  %v723_v7 = vld [vmem:[#allocation9] sm:$0x3f]  ;;  %v498_v24 = vld [vmem:[#allocation8] sm:$0xff]   ;;  %vm334_vm2 = vcmask 257024  }
  0x3e   :  { %466 = vmatprep.subr.bf16.mxu1 %v645_v0  ;;  %470 = vmatprep.mubr.msk.bf16.mxu1 %vm646_vm0, %v645_v0  ;;  %v720_v5 = vshrl.u32 %v102_v4, 7  ;;  %v497_v23 = vld [vmem:[#allocation8 + $0x8] sm:$0xff]   ;;  %s647_s21 = smov [#allocation12]  }
  0x3f   :  { %459 = vmatpush3.bf16.msra.mxu0 %v494_v1  ;;  %467 = vmatpush3.bf16.msra.mxu1 %v497_v23  ;;  %s419_s22 = sshll.u32 %s647_s21, 4  ;;  %s420_s22 = int_to_ptr.vmem [resolvable:$true] %s419_s22 }
  0x40   :  { %460 = vmatprep.subr.bf16.mxu0 %v645_v0  ;;  %v104_v6 = vsub.s32 0, %v720_v5  ;;  %468 = vmatprep.subr.bf16.mxu1 %v645_v0  ;;  %v205_v41 = vsub.s32 1, %v720_v5  ;;  %v211_v46 = vsub.s32 2, %v720_v5  ;;  %v222_v56 = vsub.s32 3, %v720_v5  ;;  %s610_s23 = scalar_lea.vmem %s420_s22, 256  ;;  %p615_p12 = scmp.lt.s32.totalorder %s420_s22, %s420_s22 }
  0x41   :  { %p611_p11 = scmp.ne.s32.totalorder %s420_s22, %s610_s23  ;;  %p616_p13 = scmp.lt.s32.totalorder %s610_s23, %s610_s23 }
  0x42   :  { %v105_v8 = vrot.slane %v723_v7, %v104_v6  ;;  %v206_v45 = vrot.slane %v723_v7, %v205_v41  ;;  %v212_v51 = vrot.slane %v723_v7, %v211_v46  ;;  %v223_v57 = vrot.slane %v723_v7, %v222_v56 }
  0x43   :  { %461 = vmatpush3.bf16.msra.mxu0 %v495_v2  ;;  %469 = vmatpush3.bf16.msra.mxu1 %v498_v24  ;;  %p617_p0 = por %p616_p13, %p615_p12 }
  0x44   :  { %474 = vmatprep.subr.bf16.mxu0 %v645_v0 }
  0x45   :  { %p618_p1 = pnand %p617_p0, %p611_p11 }
  0x46   :  { %463 = vmatmul.mubr.msk.bf16.vlgmr.msra.gmra.mxu0 %vm123_vm1, %v496_v3 }
  0x47   :  { %478 = vmatprep.mubr.msk.bf16.mxu0 %vm646_vm0, %v645_v0 }
 0x106   :  { %v161_v9 = vpop.f32.mrf.mxu0 }
 0x107   :  { %v162_v10 = vadd.f32 %v161_v9, %v105_v8 }
 0x108   :  { %v464_v11 = vpop.f32.mrf.mxu0 }
 0x109   :  { %v168_v12 = vmax.f32 %v162_v10, 0.0  ;;  %v499_v11 = vld [vmem:[#allocation11 + $0x8] sm:$0xff]  }
 0x10a   :  { %v164_v13 = vpop.f32.mrf.mxu0  ;;  %475 = vmatpush3.bf16.msra.mxu0 %v499_v11 }
 0x10b   :  { %v165_v14 = vadd.f32 %v164_v13, %v105_v8  ;;  %v170_v15 = vsel %vm123_vm1, %v168_v12, 0.0  ;;  %v179_v16 = vmul.f32 %v168_v12, %v168_v12  ;;  %476 = vmatprep.subr.bf16.mxu0 %v645_v0  ;;  %v316_v0 = vsub.s32 4, %v720_v5 }
 0x10c   :  { %171 = vadd.xlane.f32.xlu0 %v170_v15  ;;  %v465_v17 = vpop.f32.mrf.mxu0 }
 0x10d   :  { %v169_v18 = vmax.f32 %v165_v14, 0.0  ;;  %v181_v19 = vsel %vm123_vm1, %v179_v16, 0.0 }
 0x10e   :  { %182 = vadd.xlane.f32.xlu1 %v181_v19 }
 0x10f   :  { %v173_v20 = vsel %vm123_vm1, %v169_v18, 0.0  ;;  %v180_v21 = vmul.f32 %v169_v18, %v169_v18 }
 0x110   :  { %174 = vadd.xlane.f32.xlu0 %v173_v20 }
 0x111   :  { %v184_v22 = vsel %vm123_vm1, %v180_v21, 0.0 }
 0x112   :  { %185 = vadd.xlane.f32.xlu1 %v184_v22 }
 0x195   :  { %v172_v25 = vpop.xlane.xlu0 %171 }
 0x196   :  { %v177_v26 = vmul.f32 0.03125, %v172_v25 }
 0x197   :  { %v183_v27 = vpop.xlane.xlu1 %182 }
 0x198   :  { %v189_v28 = vmul.f32 %v177_v26, %v177_v26  ;;  %v187_v29 = vmul.f32 0.03125, %v183_v27  ;;  %v195_v42 = vsub.f32 %v168_v12, %v177_v26  ;;  %v500_v12 = vld [vmem:[#allocation11] sm:$0xff]  }
 0x199   :  { %v175_v30 = vpop.xlane.xlu0 %174  ;;  %477 = vmatpush3.bf16.msra.mxu0 %v500_v12 }
 0x19a   :  { %v191_v31 = vsub.f32 %v187_v29, %v189_v28  ;;  %v178_v32 = vmul.f32 0.03125, %v175_v30  ;;  %v322_v29 = vsub.s32 5, %v720_v5  ;;  %v317_v30 = vrot.slane %v723_v7, %v316_v0 }
 0x19b   :  { %v186_v33 = vpop.xlane.xlu1 %185 }
 0x19c   :  { %v193_v34 = vmax.f32 %v191_v31, 0.0  ;;  %v190_v35 = vmul.f32 %v178_v32, %v178_v32  ;;  %v188_v36 = vmul.f32 0.03125, %v186_v33  ;;  %v196_v47 = vsub.f32 %v169_v18, %v178_v32 }
 0x19d   :  { %v323_v33 = vrot.slane %v723_v7, %v322_v29  ;;  %v442_v7 = vld [vmem:[%s759_s5] ss:$0 sm:$0xff] }
 0x19e   :  { %v197_v37 = vadd.f32 1e-05, %v193_v34  ;;  %v192_v38 = vsub.f32 %v188_v36, %v190_v35 }
 0x1a0   :  { %502 = vrsqrt.f32 %v197_v37  ;;  %v194_v39 = vmax.f32 %v192_v38, 0.0 }
 0x1a2   :  { %v198_v40 = vadd.f32 1e-05, %v194_v39 }
 0x1a4   :  { %504 = vrsqrt.f32 %v198_v40 }
 0x1ad   :  { %v503_v43 = vpop.eup %502 }
 0x1ae   :  { %v201_v44 = vmul.f32 %v503_v43, %v195_v42 }
 0x1b0   :  { %v207_v50 = vmul.f32 %v206_v45, %v201_v44 }
 0x1b1   :  { %v505_v48 = vpop.eup %504 }
 0x1b2   :  { %v202_v49 = vmul.f32 %v505_v48, %v196_v47  ;;  %v213_v53 = vadd.f32 %v212_v51, %v207_v50 }
 0x1b4   :  { %v208_v52 = vmul.f32 %v206_v45, %v202_v49 }
 0x1b6   :  { %v214_v54 = vadd.f32 %v212_v51, %v208_v52 }
 0x1b8   :  { %v215_v55 = vpack.c.bf16 %v214_v54, %v213_v53 }
 0x1ba   :  { %471 = vmatmul.mubr.msk.bf16.vlgmr.msra.gmra.mxu1 %vm123_vm1, %v215_v55 }
 0x27a   :  { %v273_v58 = vpop.f32.mrf.mxu1 }
 0x27b   :  { %v274_v59 = vadd.f32 %v273_v58, %v223_v57 }
 0x27c   :  { %v472_v60 = vpop.f32.mrf.mxu1 }
 0x27d   :  { %v280_v61 = vmax.f32 %v274_v59, 0.0 }
 0x27e   :  { %v276_v62 = vpop.f32.mrf.mxu1 }
 0x27f   :  { %v277_v63 = vadd.f32 %v276_v62, %v223_v57  ;;  %v282_v1 = vsel %vm123_vm1, %v280_v61, 0.0  ;;  %v290_v2 = vmul.f32 %v280_v61, %v280_v61 }
 0x280   :  { %283 = vadd.xlane.f32.xlu0 %v282_v1  ;;  %v473_v3 = vpop.f32.mrf.mxu1 }
 0x281   :  { %v281_v4 = vmax.f32 %v277_v63, 0.0  ;;  %v292_v6 = vsel %vm123_vm1, %v290_v2, 0.0 }
 0x283   :  { %v285_v8 = vsel %vm123_vm1, %v281_v4, 0.0  ;;  %v291_v9 = vmul.f32 %v281_v4, %v281_v4 }
 0x284   :  { %293 = vadd.xlane.f32.xlu0 %v292_v6  ;;  %286 = vadd.xlane.f32.xlu1 %v285_v8 }
 0x285   :  { %v295_v10 = vsel %vm123_vm1, %v291_v9, 0.0 }
 0x288   :  { %296 = vadd.xlane.f32.xlu1 %v295_v10 }
 0x309   :  { %v284_v13 = vpop.xlane.xlu0 %283 }
 0x30a   :  { %v288_v14 = vmul.f32 0.03125, %v284_v13 }
 0x30c   :  { %v300_v17 = vmul.f32 %v288_v14, %v288_v14  ;;  %v306_v31 = vsub.f32 %v280_v61, %v288_v14 }
 0x30d   :  { %v294_v15 = vpop.xlane.xlu0 %293  ;;  %v287_v16 = vpop.xlane.xlu1 %286 }
 0x30e   :  { %v298_v18 = vmul.f32 0.03125, %v294_v15  ;;  %v289_v19 = vmul.f32 0.03125, %v287_v16 }
 0x310   :  { %v302_v20 = vsub.f32 %v298_v18, %v300_v17  ;;  %v301_v23 = vmul.f32 %v289_v19, %v289_v19  ;;  %v307_v36 = vsub.f32 %v281_v4, %v289_v19 }
 0x311   :  { %v297_v21 = vpop.xlane.xlu1 %296 }
 0x312   :  { %v304_v22 = vmax.f32 %v302_v20, 0.0  ;;  %v299_v24 = vmul.f32 0.03125, %v297_v21 }
 0x314   :  { %v308_v25 = vadd.f32 1e-05, %v304_v22  ;;  %v303_v26 = vsub.f32 %v299_v24, %v301_v23 }
 0x316   :  { %506 = vrsqrt.f32 %v308_v25  ;;  %v305_v27 = vmax.f32 %v303_v26, 0.0 }
 0x318   :  { %v309_v28 = vadd.f32 1e-05, %v305_v27 }
 0x31a   :  { %508 = vrsqrt.f32 %v309_v28 }
 0x323   :  { %v507_v32 = vpop.eup %506 }
 0x324   :  { %v312_v34 = vmul.f32 %v507_v32, %v306_v31 }
 0x326   :  { %v318_v35 = vmul.f32 %v317_v30, %v312_v34 }
 0x327   :  { %v509_v37 = vpop.eup %508 }
 0x328   :  { %v324_v38 = vadd.f32 %v323_v33, %v318_v35  ;;  %v313_v39 = vmul.f32 %v509_v37, %v307_v36 }
 0x32a   :  { %v447_v40 = vpack.c.bf16 %v324_v38, %v324_v38  ;;  %v319_v41 = vmul.f32 %v317_v30, %v313_v39 }
 0x32c   :  { %335 = vst.msk [vmem:[#allocation2] sm:$0xf] %vm334_vm2, %v447_v40  ;;  %v325_v42 = vadd.f32 %v323_v33, %v319_v41 }
 0x32e   :  { %v448_v43 = vpack.c.bf16 %v325_v42, %v325_v42 }
 0x330   :  { %336 = vst.msk [vmem:[#allocation2 + $0x4] sm:$0xf] %vm334_vm2, %v448_v43 }
 0x337   :  { %v501_v5 = vld [vmem:[#allocation2] sm:$0xff]  }
 0x338   :  { %479 = vmatmul.mubr.msk.bf16.vlgmr.msra.gmra.mxu0 %vm123_vm1, %v501_v5 }
 0x3f8   :  { %v405_v44 = vpop.f32.mrf.mxu0 }
 0x3f9   :  { %v406_v45 = vadd.f32 %v442_v7, %v405_v44 }
 0x3fa   :  { %v480_v46 = vpop.f32.mrf.mxu0 }
 0x3fb   :  { %412 = vst [vmem:[#allocation12] sm:$0xff] %v406_v45 }
 0x3fc   :  { %v408_v47 = vpop.f32.mrf.mxu0 }
 0x3fd   :  { %v409_v48 = vadd.f32 %v442_v7, %v408_v47 }
 0x3fe   :  { %v481_v49 = vpop.f32.mrf.mxu0 }
 0x3ff   :  { %413 = vst [vmem:[#allocation12 + $0x8] sm:$0xff] %v409_v48 }
 0x400   :  { %621 = shalt.err (!%p618_p1)
}
 0x401   :  { %s648_s24 = smov 128   ;;  %s649_s5 = smov 8  }
 0x402   :  { %425 = dma.vmem_to_hbm [thread:$0]  %s420_s22, 256, %s760_s6, [#allocation5], %s648_s24, %s648_s24, %s649_s5  }
 0x403   :  { %636 = dma.done.wait [#allocation5], 256  }
 0x404   :  { %637 = vsyncadd [#allocation5], 4294967040 }
 0x405   :  { %429 = vsyncpa [#allocation4], 1 }
 0x406   :  { %430 = vsyncpa [#allocation7], 1 }
 0x407   :  { %431 = vsyncpa [#allocation10], 1 }
 0x408   :  { %432 = vsyncpa [#allocation5], 1 }

</bundles_post_ra>
